<compile_context>
chip_gen: v7x
topology: tpu7x:2x2x1
jax: 0.10.0
libtpu: 0.0.40
codegen_flags: <defaults>
</compile_context>

<pallas_src>
import jax
import jax.numpy as jnp
from jax.experimental import pallas as pl
from jax.experimental.pallas import tpu as pltpu

IN_DIM = 28 * 28  # 784


def _round_up(x, m):
    return (x + m - 1) // m * m


# ----------------------------- Pallas kernel -------------------------------
def _autoencoder_kernel(x_ref,
                        w1_ref, b1_ref,
                        w2_ref, b2_ref,
                        w3_ref, b3_ref,
                        w4_ref, b4_ref,
                        w5_ref, b5_ref,
                        w6_ref, b6_ref,
                        out_ref):
    """Fused encoder+decoder for one [TB, 784] batch tile.

    Matmuls run on the MXU with bf16 operands and f32 accumulation; bias add,
    ReLU and the sigmoid run in f32 on the VPU/EUP.
    """

    def dense(h_f32, w_ref, b_ref):
        return jnp.dot(h_f32.astype(jnp.bfloat16), w_ref[...],
                       preferred_element_type=jnp.float32) + b_ref[...]

    x = x_ref[...]                                   # f32 [TB, 784]

    # ---- encoder ----
    h = jnp.maximum(dense(x, w1_ref, b1_ref), 0.0)   # [TB, 128]
    h = jnp.maximum(dense(h, w2_ref, b2_ref), 0.0)   # [TB, 128]
    z = dense(h, w3_ref, b3_ref)                     # latent (padded to 128)

    # ---- decoder ----
    d = jnp.maximum(dense(z, w4_ref, b4_ref), 0.0)   # [TB, 128]
    d = jnp.maximum(dense(d, w5_ref, b5_ref), 0.0)   # [TB, 128]
    logits = dense(d, w6_ref, b6_ref)                # f32 [TB, 784]

    # Sigmoid: exp on EUP, divide as approximate reciprocal (also EUP).
    out_ref[...] = pl.reciprocal(1.0 + jnp.exp(-logits),
                                 approx=True).astype(out_ref.dtype)


# --------------------------- parameter padding ------------------------------
def _pad_params(params):
    """Zero-pad hidden dims to multiples of 128, cast weights to bf16.

    Weights are stored [in, out] (transpose of torch's [out, in]); biases are
    kept f32 and shaped (1, out) for TPU layout. Padded rows/cols/bias lanes
    are zero, so padded activation lanes stay exactly zero.
    """
    flat = []
    in_dim = IN_DIM
    for (w, b) in params:
        fan_in, fan_out = w.shape
        p_in = in_dim
        p_out = fan_out if fan_out == IN_DIM else _round_up(fan_out, 128)
        w_p = jnp.zeros((p_in, p_out), jnp.float32).at[:fan_in, :fan_out].set(w)
        b_p = jnp.zeros((1, p_out), jnp.float32).at[0, :fan_out].set(b)
        flat.append(w_p.astype(jnp.bfloat16))
        flat.append(b_p)
        in_dim = p_out
    return flat


# ------------------------------ wrapper ------------------------------------
@jax.jit
def linear_autoencoder_forward(x, params):
    """x: [..., 28, 28] (anything flattening to [-1, 784]). Returns [-1, 28, 28]."""
    x2d = x.reshape(-1, IN_DIM).astype(jnp.float32)
    B = x2d.shape[0]

    # Batch tile: large enough for good pipelining, multiple of 16 rows, but do
    # not blow up tiny demo batches. Cap at 512 so 2x(in+out) tiles plus
    # resident weights fit comfortably even under v7x's tighter VMEM.
    TB = min(512, _round_up(max(B, 1), 16))
    B_pad = _round_up(B, TB)
    if B_pad != B:
        x2d = jnp.pad(x2d, ((0, B_pad - B), (0, 0)))

    flat_params = _pad_params(params)
    weight_specs = [pl.BlockSpec(p.shape, lambda i: (0, 0)) for p in flat_params]

    # Advisory cost estimate for the XLA scheduler.
    flops = 2 * B_pad * sum(int(w.shape[0]) * int(w.shape[1])
                            for w in flat_params[0::2])
    bytes_accessed = (B_pad * IN_DIM * 4          # x read (f32)
                      + B_pad * IN_DIM * 4        # out write (f32)
                      + sum(int(p.size) * p.dtype.itemsize for p in flat_params))

    out = pl.pallas_call(
        _autoencoder_kernel,
        grid=(B_pad // TB,),
        out_shape=jax.ShapeDtypeStruct((B_pad, IN_DIM), jnp.float32),
        in_specs=[pl.BlockSpec((TB, IN_DIM), lambda i: (i, 0))] + weight_specs,
        out_specs=pl.BlockSpec((TB, IN_DIM), lambda i: (i, 0)),
        compiler_params=pltpu.CompilerParams(
            dimension_semantics=("parallel",),
            vmem_limit_bytes=32 * 1024 * 1024),
        cost_estimate=pl.CostEstimate(
            flops=flops,
            transcendentals=B_pad * IN_DIM,
            bytes_accessed=bytes_accessed),
    )(x2d, *flat_params)

    return out[:B].reshape(-1, 28, 28)


# --------------------------- init (torch-like) ------------------------------
def init_params(key):
    """Deterministic init matching the nn.Linear shapes. Weights stored [in, out]."""
    dims = [(IN_DIM, 100), (100, 50), (50, 10),      # encoder
            (10, 50), (50, 100), (100, IN_DIM)]      # decoder
    params = []
    for (fan_in, fan_out) in dims:
        key, kw, kb = jax.random.split(key, 3)
        bound = 1.0 / jnp.sqrt(jnp.float32(fan_in))  # torch default uniform bound
        w = jax.random.uniform(kw, (fan_in, fan_out), jnp.float32, -bound, bound)
        b = jax.random.uniform(kb, (fan_out,), jnp.float32, -bound, bound)
        params.append((w, b))
    return params


# ------------------------- pure-JAX f32 reference ---------------------------
def _reference_forward(x, params):
    h = x.reshape(-1, IN_DIM).astype(jnp.float32)
    (w1, b1), (w2, b2), (w3, b3), (w4, b4), (w5, b5), (w6, b6) = params
    h = jnp.maximum(h @ w1 + b1, 0.0)
    h = jnp.maximum(h @ w2 + b2, 0.0)
    z = h @ w3 + b3
    d = jnp.maximum(z @ w4 + b4, 0.0)
    d = jnp.maximum(d @ w5 + b5, 0.0)
    p = jax.nn.sigmoid(d @ w6 + b6)
    return p.reshape(-1, 28, 28)


if __name__ == "__main__":
    key = jax.random.PRNGKey(0)
    kx, kp = jax.random.split(key)

    params = init_params(kp)
    x = jax.random.normal(kx, (2, 28, 28), dtype=jnp.float32)  # batch=2 "images"

    out = linear_autoencoder_forward(x, params)
    out = jax.block_until_ready(out)

    ref = _reference_forward(x, params)
    assert out.shape == (2, 28, 28), out.shape
    # bf16 matmul operands + approximate reciprocal => compare to the exact f32
    # reference with a tolerance comfortably covering the reduced precision.
    assert jnp.allclose(out, ref, atol=2e-2, rtol=0.0), \
        float(jnp.max(jnp.abs(out - ref)))

    print("KERNEL_OK")
</pallas_src>

<mosaic_0001>
module attributes {stable_mosaic.version = 11 : i64} {
  func.func @_autoencoder_kernel(%arg0: i32, %arg1: memref<16x784xf32, #tpu.memory_space<vmem>>, %arg2: memref<784x128xbf16, #tpu.memory_space<vmem>>, %arg3: memref<1x128xf32, #tpu.memory_space<vmem>>, %arg4: memref<128x128xbf16, #tpu.memory_space<vmem>>, %arg5: memref<1x128xf32, #tpu.memory_space<vmem>>, %arg6: memref<128x128xbf16, #tpu.memory_space<vmem>>, %arg7: memref<1x128xf32, #tpu.memory_space<vmem>>, %arg8: memref<128x128xbf16, #tpu.memory_space<vmem>>, %arg9: memref<1x128xf32, #tpu.memory_space<vmem>>, %arg10: memref<128x128xbf16, #tpu.memory_space<vmem>>, %arg11: memref<1x128xf32, #tpu.memory_space<vmem>>, %arg12: memref<128x784xbf16, #tpu.memory_space<vmem>>, %arg13: memref<1x784xf32, #tpu.memory_space<vmem>>, %arg14: memref<16x784xf32, #tpu.memory_space<vmem>>) attributes {dimension_semantics = [#tpu.dimension_semantics<parallel>], iteration_bounds = array<i64: 1>, scalar_prefetch = 0 : i64, scratch_operands = 0 : i64, tpu.core_type = #tpu.core_type<tc>, window_params = [{transform_indices = @transform_0, window_bounds = array<i64: 16, 784>}, {pipeline_mode = #tpu.pipeline_mode<synchronous>, transform_indices = @transform_1, window_bounds = array<i64: 784, 128>}, {pipeline_mode = #tpu.pipeline_mode<synchronous>, transform_indices = @transform_2, window_bounds = array<i64: 1, 128>}, {pipeline_mode = #tpu.pipeline_mode<synchronous>, transform_indices = @transform_3, window_bounds = array<i64: 128, 128>}, {pipeline_mode = #tpu.pipeline_mode<synchronous>, transform_indices = @transform_4, window_bounds = array<i64: 1, 128>}, {pipeline_mode = #tpu.pipeline_mode<synchronous>, transform_indices = @transform_5, window_bounds = array<i64: 128, 128>}, {pipeline_mode = #tpu.pipeline_mode<synchronous>, transform_indices = @transform_6, window_bounds = array<i64: 1, 128>}, {pipeline_mode = #tpu.pipeline_mode<synchronous>, transform_indices = @transform_7, window_bounds = array<i64: 128, 128>}, {pipeline_mode = #tpu.pipeline_mode<synchronous>, transform_indices = @transform_8, window_bounds = array<i64: 1, 128>}, {pipeline_mode = #tpu.pipeline_mode<synchronous>, transform_indices = @transform_9, window_bounds = array<i64: 128, 128>}, {pipeline_mode = #tpu.pipeline_mode<synchronous>, transform_indices = @transform_10, window_bounds = array<i64: 1, 128>}, {pipeline_mode = #tpu.pipeline_mode<synchronous>, transform_indices = @transform_11, window_bounds = array<i64: 128, 784>}, {pipeline_mode = #tpu.pipeline_mode<synchronous>, transform_indices = @transform_12, window_bounds = array<i64: 1, 784>}, {transform_indices = @transform_13, window_bounds = array<i64: 16, 784>}]} {
    %c0 = arith.constant 0 : index
    %c0_0 = arith.constant 0 : index
    %0 = vector.load %arg1[%c0, %c0_0] : memref<16x784xf32, #tpu.memory_space<vmem>>, vector<16x784xf32>
    %1 = arith.truncf %0 : vector<16x784xf32> to vector<16x784xbf16>
    %c0_1 = arith.constant 0 : index
    %c0_2 = arith.constant 0 : index
    %2 = vector.load %arg2[%c0_1, %c0_2] : memref<784x128xbf16, #tpu.memory_space<vmem>>, vector<784x128xbf16>
    %cst = arith.constant dense<0.000000e+00> : vector<16x128xf32>
    %3 = tpu.matmul %1, %2, %cst {dimension_numbers = #tpu.dot_dimension_numbers<[1], [0], [0], [1], [0, 0, 1, 1], [], []>} : vector<16x784xbf16>, vector<784x128xbf16>, vector<16x128xf32> -> vector<16x128xf32>
    %c0_3 = arith.constant 0 : index
    %c0_4 = arith.constant 0 : index
    %4 = vector.load %arg3[%c0_3, %c0_4] : memref<1x128xf32, #tpu.memory_space<vmem>>, vector<1x128xf32>
    %5 = vector.broadcast %4 : vector<1x128xf32> to vector<16x128xf32>
    %6 = arith.addf %3, %5 : vector<16x128xf32>
    %cst_5 = arith.constant 0.000000e+00 : f32
    %7 = vector.broadcast %cst_5 : f32 to vector<16x128xf32>
    %8 = arith.maximumf %6, %7 : vector<16x128xf32>
    %9 = arith.truncf %8 : vector<16x128xf32> to vector<16x128xbf16>
    %c0_6 = arith.constant 0 : index
    %c0_7 = arith.constant 0 : index
    %10 = vector.load %arg4[%c0_6, %c0_7] : memref<128x128xbf16, #tpu.memory_space<vmem>>, vector<128x128xbf16>
    %cst_8 = arith.constant dense<0.000000e+00> : vector<16x128xf32>
    %11 = tpu.matmul %9, %10, %cst_8 {dimension_numbers = #tpu.dot_dimension_numbers<[1], [0], [0], [1], [0, 0, 1, 1], [], []>} : vector<16x128xbf16>, vector<128x128xbf16>, vector<16x128xf32> -> vector<16x128xf32>
    %c0_9 = arith.constant 0 : index
    %c0_10 = arith.constant 0 : index
    %12 = vector.load %arg5[%c0_9, %c0_10] : memref<1x128xf32, #tpu.memory_space<vmem>>, vector<1x128xf32>
    %13 = vector.broadcast %12 : vector<1x128xf32> to vector<16x128xf32>
    %14 = arith.addf %11, %13 : vector<16x128xf32>
    %cst_11 = arith.constant 0.000000e+00 : f32
    %15 = vector.broadcast %cst_11 : f32 to vector<16x128xf32>
    %16 = arith.maximumf %14, %15 : vector<16x128xf32>
    %17 = arith.truncf %16 : vector<16x128xf32> to vector<16x128xbf16>
    %c0_12 = arith.constant 0 : index
    %c0_13 = arith.constant 0 : index
    %18 = vector.load %arg6[%c0_12, %c0_13] : memref<128x128xbf16, #tpu.memory_space<vmem>>, vector<128x128xbf16>
    %cst_14 = arith.constant dense<0.000000e+00> : vector<16x128xf32>
    %19 = tpu.matmul %17, %18, %cst_14 {dimension_numbers = #tpu.dot_dimension_numbers<[1], [0], [0], [1], [0, 0, 1, 1], [], []>} : vector<16x128xbf16>, vector<128x128xbf16>, vector<16x128xf32> -> vector<16x128xf32>
    %c0_15 = arith.constant 0 : index
    %c0_16 = arith.constant 0 : index
    %20 = vector.load %arg7[%c0_15, %c0_16] : memref<1x128xf32, #tpu.memory_space<vmem>>, vector<1x128xf32>
    %21 = vector.broadcast %20 : vector<1x128xf32> to vector<16x128xf32>
    %22 = arith.addf %19, %21 : vector<16x128xf32>
    %23 = arith.truncf %22 : vector<16x128xf32> to vector<16x128xbf16>
    %c0_17 = arith.constant 0 : index
    %c0_18 = arith.constant 0 : index
    %24 = vector.load %arg8[%c0_17, %c0_18] : memref<128x128xbf16, #tpu.memory_space<vmem>>, vector<128x128xbf16>
    %cst_19 = arith.constant dense<0.000000e+00> : vector<16x128xf32>
    %25 = tpu.matmul %23, %24, %cst_19 {dimension_numbers = #tpu.dot_dimension_numbers<[1], [0], [0], [1], [0, 0, 1, 1], [], []>} : vector<16x128xbf16>, vector<128x128xbf16>, vector<16x128xf32> -> vector<16x128xf32>
    %c0_20 = arith.constant 0 : index
    %c0_21 = arith.constant 0 : index
    %26 = vector.load %arg9[%c0_20, %c0_21] : memref<1x128xf32, #tpu.memory_space<vmem>>, vector<1x128xf32>
    %27 = vector.broadcast %26 : vector<1x128xf32> to vector<16x128xf32>
    %28 = arith.addf %25, %27 : vector<16x128xf32>
    %cst_22 = arith.constant 0.000000e+00 : f32
    %29 = vector.broadcast %cst_22 : f32 to vector<16x128xf32>
    %30 = arith.maximumf %28, %29 : vector<16x128xf32>
    %31 = arith.truncf %30 : vector<16x128xf32> to vector<16x128xbf16>
    %c0_23 = arith.constant 0 : index
    %c0_24 = arith.constant 0 : index
    %32 = vector.load %arg10[%c0_23, %c0_24] : memref<128x128xbf16, #tpu.memory_space<vmem>>, vector<128x128xbf16>
    %cst_25 = arith.constant dense<0.000000e+00> : vector<16x128xf32>
    %33 = tpu.matmul %31, %32, %cst_25 {dimension_numbers = #tpu.dot_dimension_numbers<[1], [0], [0], [1], [0, 0, 1, 1], [], []>} : vector<16x128xbf16>, vector<128x128xbf16>, vector<16x128xf32> -> vector<16x128xf32>
    %c0_26 = arith.constant 0 : index
    %c0_27 = arith.constant 0 : index
    %34 = vector.load %arg11[%c0_26, %c0_27] : memref<1x128xf32, #tpu.memory_space<vmem>>, vector<1x128xf32>
    %35 = vector.broadcast %34 : vector<1x128xf32> to vector<16x128xf32>
    %36 = arith.addf %33, %35 : vector<16x128xf32>
    %cst_28 = arith.constant 0.000000e+00 : f32
    %37 = vector.broadcast %cst_28 : f32 to vector<16x128xf32>
    %38 = arith.maximumf %36, %37 : vector<16x128xf32>
    %39 = arith.truncf %38 : vector<16x128xf32> to vector<16x128xbf16>
    %c0_29 = arith.constant 0 : index
    %c0_30 = arith.constant 0 : index
    %40 = vector.load %arg12[%c0_29, %c0_30] : memref<128x784xbf16, #tpu.memory_space<vmem>>, vector<128x784xbf16>
    %cst_31 = arith.constant dense<0.000000e+00> : vector<16x784xf32>
    %41 = tpu.matmul %39, %40, %cst_31 {dimension_numbers = #tpu.dot_dimension_numbers<[1], [0], [0], [1], [0, 0, 1, 1], [], []>} : vector<16x128xbf16>, vector<128x784xbf16>, vector<16x784xf32> -> vector<16x784xf32>
    %c0_32 = arith.constant 0 : index
    %c0_33 = arith.constant 0 : index
    %42 = vector.load %arg13[%c0_32, %c0_33] : memref<1x784xf32, #tpu.memory_space<vmem>>, vector<1x784xf32>
    %43 = vector.broadcast %42 : vector<1x784xf32> to vector<16x784xf32>
    %44 = arith.addf %41, %43 : vector<16x784xf32>
    %cst_34 = arith.constant 0.000000e+00 : f32
    %45 = vector.broadcast %cst_34 : f32 to vector<16x784xf32>
    %46 = arith.subf %45, %44 : vector<16x784xf32>
    %47 = math.exp %46 : vector<16x784xf32>
    %cst_35 = arith.constant 1.000000e+00 : f32
    %48 = vector.broadcast %cst_35 : f32 to vector<16x784xf32>
    %49 = arith.addf %48, %47 : vector<16x784xf32>
    %50 = tpu.reciprocal %49 {approx = true} : vector<16x784xf32> -> vector<16x784xf32>
    %c0_36 = arith.constant 0 : index
    %c0_37 = arith.constant 0 : index
    %51 = vector.load %arg14[%c0_36, %c0_37] : memref<16x784xf32, #tpu.memory_space<vmem>>, vector<16x784xf32>
    tpu.vector_store %arg14[%c0_36, %c0_37], %50 {strides = array<i32>} : memref<16x784xf32, #tpu.memory_space<vmem>>, vector<16x784xf32>,
    return
  }
  func.func @transform_0(%arg0: i32) -> (i32, i32) {
    %c0_i32 = arith.constant 0 : i32
    %c0_i32_0 = arith.constant 0 : i32
    return %arg0, %c0_i32 : i32, i32
  }
  func.func @transform_1(%arg0: i32) -> (i32, i32) {
    %c0_i32 = arith.constant 0 : i32
    %c0_i32_0 = arith.constant 0 : i32
    %c0_i32_1 = arith.constant 0 : i32
    return %c0_i32, %c0_i32_0 : i32, i32
  }
  func.func @transform_2(%arg0: i32) -> (i32, i32) {
    %c0_i32 = arith.constant 0 : i32
    %c0_i32_0 = arith.constant 0 : i32
    %c0_i32_1 = arith.constant 0 : i32
    return %c0_i32, %c0_i32_0 : i32, i32
  }
  func.func @transform_3(%arg0: i32) -> (i32, i32) {
    %c0_i32 = arith.constant 0 : i32
    %c0_i32_0 = arith.constant 0 : i32
    %c0_i32_1 = arith.constant 0 : i32
    return %c0_i32, %c0_i32_0 : i32, i32
  }
  func.func @transform_4(%arg0: i32) -> (i32, i32) {
    %c0_i32 = arith.constant 0 : i32
    %c0_i32_0 = arith.constant 0 : i32
    %c0_i32_1 = arith.constant 0 : i32
    return %c0_i32, %c0_i32_0 : i32, i32
  }
  func.func @transform_5(%arg0: i32) -> (i32, i32) {
    %c0_i32 = arith.constant 0 : i32
    %c0_i32_0 = arith.constant 0 : i32
    %c0_i32_1 = arith.constant 0 : i32
    return %c0_i32, %c0_i32_0 : i32, i32
  }
  func.func @transform_6(%arg0: i32) -> (i32, i32) {
    %c0_i32 = arith.constant 0 : i32
    %c0_i32_0 = arith.constant 0 : i32
    %c0_i32_1 = arith.constant 0 : i32
    return %c0_i32, %c0_i32_0 : i32, i32
  }
  func.func @transform_7(%arg0: i32) -> (i32, i32) {
    %c0_i32 = arith.constant 0 : i32
    %c0_i32_0 = arith.constant 0 : i32
    %c0_i32_1 = arith.constant 0 : i32
    return %c0_i32, %c0_i32_0 : i32, i32
  }
  func.func @transform_8(%arg0: i32) -> (i32, i32) {
    %c0_i32 = arith.constant 0 : i32
    %c0_i32_0 = arith.constant 0 : i32
    %c0_i32_1 = arith.constant 0 : i32
    return %c0_i32, %c0_i32_0 : i32, i32
  }
  func.func @transform_9(%arg0: i32) -> (i32, i32) {
    %c0_i32 = arith.constant 0 : i32
    %c0_i32_0 = arith.constant 0 : i32
    %c0_i32_1 = arith.constant 0 : i32
    return %c0_i32, %c0_i32_0 : i32, i32
  }
  func.func @transform_10(%arg0: i32) -> (i32, i32) {
    %c0_i32 = arith.constant 0 : i32
    %c0_i32_0 = arith.constant 0 : i32
    %c0_i32_1 = arith.constant 0 : i32
    return %c0_i32, %c0_i32_0 : i32, i32
  }
  func.func @transform_11(%arg0: i32) -> (i32, i32) {
    %c0_i32 = arith.constant 0 : i32
    %c0_i32_0 = arith.constant 0 : i32
    %c0_i32_1 = arith.constant 0 : i32
    return %c0_i32, %c0_i32_0 : i32, i32
  }
  func.func @transform_12(%arg0: i32) -> (i32, i32) {
    %c0_i32 = arith.constant 0 : i32
    %c0_i32_0 = arith.constant 0 : i32
    %c0_i32_1 = arith.constant 0 : i32
    return %c0_i32, %c0_i32_0 : i32, i32
  }
  func.func @transform_13(%arg0: i32) -> (i32, i32) {
    %c0_i32 = arith.constant 0 : i32
    %c0_i32_0 = arith.constant 0 : i32
    return %arg0, %c0_i32 : i32, i32
  }
}

</mosaic_0001>

<bundles_post_ra>
// kernel: linear_autoencoder_forward.1
= control target key start
LH: loop header
LB: loop body
LE: loop exit
PB: predicated region body
PF: predicated region fallthrough
CT: control target
= control target key end

     0   :  { %v2323_v43 = vmov 0.0   ;;  %vm2324_vm0 = vmmov 0   ;;  %vm465_vm1 = vcmask 130048   ;;  %s2983_s1 = inlined_call_operand.vmem [shape: bf16[784,128], index: 1, kind: input, shape index: {}]   ;;  %s2984_s0 = inlined_call_operand.vmem [shape: f32[16,784], index: 0, kind: input, shape index: {}]   ;;  %s2985_s3 = inlined_call_operand.vmem [shape: bf16[128,128], index: 3, kind: input, shape index: {}]   ;;  %s2986_s5 = inlined_call_operand.vmem [shape: bf16[128,128], index: 5, kind: input, shape index: {}]   ;;  %s2987_s2 = inlined_call_operand.vmem [shape: f32[1,128], index: 2, kind: input, shape index: {}]   ;;  %s2988_s7 = inlined_call_operand.vmem [shape: bf16[128,128], index: 7, kind: input, shape index: {}]   ;;  %s2989_s4 = inlined_call_operand.vmem [shape: f32[1,128], index: 4, kind: input, shape index: {}]   ;;  %s2990_s9 = inlined_call_operand.vmem [shape: bf16[128,128], index: 9, kind: input, shape index: {}]   ;;  %s2991_s6 = inlined_call_operand.vmem [shape: f32[1,128], index: 6, kind: input, shape index: {}]   ;;  %s2992_s11 = inlined_call_operand.vmem [shape: bf16[128,784], index: 11, kind: input, shape index: {}]   ;;  %s2993_s8 = inlined_call_operand.vmem [shape: f32[1,128], index: 8, kind: input, shape index: {}]   ;;  %s2994_s10 = inlined_call_operand.vmem [shape: f32[1,128], index: 10, kind: input, shape index: {}]   ;;  %s2995_s12 = inlined_call_operand.vmem [shape: f32[1,784], index: 12, kind: input, shape index: {}]   ;;  %s2996_s13 = inlined_call_operand.vmem [shape: f32[16,784], index: 13, kind: output, shape index: {}]  }
   0x1   :  { %v2106_v0 = vld [vmem:[%s2983_s1 + $0x40] sm:$0xff]   ;;  %v2110_v4 = vld [vmem:[%s2983_s1 + $0x48] sm:$0xff]   ;;  %v2114_v8 = vld [vmem:[%s2983_s1 + $0x50] sm:$0xff]  }
   0x2   :  { %v2107_v1 = vld [vmem:[%s2983_s1] sm:$0xff]   ;;  %1884 = vmatprep.subr.bf16.mxu0 %v2106_v0  ;;  %v2111_v5 = vld [vmem:[%s2983_s1 + $0x8] sm:$0xff]   ;;  %v2115_v9 = vld [vmem:[%s2983_s1 + $0x10] sm:$0xff]  }
   0x3   :  { %v2108_v2 = vld [vmem:[%s2983_s1 + $0xc0] sm:$0xff]   ;;  %1885 = vmatpush3.bf16.msra.mxu0 %v2107_v1  ;;  %v2112_v6 = vld [vmem:[%s2983_s1 + $0xc8] sm:$0xff]   ;;  %v2116_v10 = vld [vmem:[%s2983_s1 + $0xd0] sm:$0xff]  }
   0x4   :  { %v2109_v3 = vld [vmem:[%s2983_s1 + $0x80] sm:$0xff]   ;;  %1906 = vmatprep.subr.bf16.mxu1 %v2108_v2  ;;  %1886 = vmatprep.subr.bf16.mxu0 %v2110_v4  ;;  %v2113_v7 = vld [vmem:[%s2983_s1 + $0x88] sm:$0xff]   ;;  %v2117_v11 = vld [vmem:[%s2983_s1 + $0x90] sm:$0xff]  }
   0x5   :  { %1907 = vmatpush3.bf16.msra.mxu1 %v2109_v3  ;;  %v2118_v12 = vld [vmem:[%s2983_s1 + $0x58] sm:$0xff]   ;;  %v2122_v16 = vld [vmem:[%s2983_s1 + $0x60] sm:$0xff]   ;;  %v2126_v20 = vld [vmem:[%s2983_s1 + $0x68] sm:$0xff]  }
   0x6   :  { %1908 = vmatprep.subr.bf16.mxu1 %v2112_v6  ;;  %v2119_v13 = vld [vmem:[%s2983_s1 + $0x18] sm:$0xff]   ;;  %v2123_v17 = vld [vmem:[%s2983_s1 + $0x20] sm:$0xff]   ;;  %v2127_v21 = vld [vmem:[%s2983_s1 + $0x28] sm:$0xff]  }
   0x7   :  { %1887 = vmatpush3.bf16.msra.mxu0 %v2111_v5  ;;  %v2120_v14 = vld [vmem:[%s2983_s1 + $0xd8] sm:$0xff]   ;;  %v2124_v18 = vld [vmem:[%s2983_s1 + $0xe0] sm:$0xff]   ;;  %v2128_v22 = vld [vmem:[%s2983_s1 + $0xe8] sm:$0xff]  }
   0x8   :  { %1888 = vmatprep.subr.bf16.mxu0 %v2114_v8  ;;  %v2121_v15 = vld [vmem:[%s2983_s1 + $0x98] sm:$0xff]   ;;  %v2125_v19 = vld [vmem:[%s2983_s1 + $0xa0] sm:$0xff]   ;;  %v2129_v23 = vld [vmem:[%s2983_s1 + $0xa8] sm:$0xff]  }
   0x9   :  { %1909 = vmatpush3.bf16.msra.mxu1 %v2113_v7  ;;  %v2130_v24 = vld [vmem:[%s2983_s1 + $0x70] sm:$0xff]   ;;  %v2134_v28 = vld [vmem:[%s2983_s1 + $0x78] sm:$0xff]   ;;  %v46_v31 = vld [vmem:[%s2984_s0 + $0x8] sm:$0xff] }
   0xa   :  { %1910 = vmatprep.subr.bf16.mxu1 %v2116_v10  ;;  %v2131_v25 = vld [vmem:[%s2983_s1 + $0x30] sm:$0xff]   ;;  %v2135_v29 = vld [vmem:[%s2983_s1 + $0x38] sm:$0xff]   ;;  %v53_v32 = vld [vmem:[%s2984_s0 + $0x40] sm:$0xff] }
   0xb   :  { %1889 = vmatpush3.bf16.msra.mxu0 %v2115_v9  ;;  %v2132_v26 = vld [vmem:[%s2983_s1 + $0xf0] sm:$0xff]   ;;  %v2136_v30 = vld [vmem:[%s2983_s1 + $0xf8] sm:$0xff]   ;;  %v60_v33 = vpack.c.bf16 %v53_v32, %v46_v31  ;;  %v45_v35 = vld [vmem:[%s2984_s0] sm:$0xff] }
   0xc   :  { %1890 = vmatprep.subr.bf16.mxu0 %v2118_v12  ;;  %v2133_v27 = vld [vmem:[%s2983_s1 + $0xb0] sm:$0xff]   ;;  %v2137_v34 = vld [vmem:[%s2983_s1 + $0xb8] sm:$0xff]   ;;  %v2138_v38 = vld [vmem:[%s2983_s1 + $0x140] sm:$0xff]  }
   0xd   :  { %1911 = vmatpush3.bf16.msra.mxu1 %v2117_v11  ;;  %v52_v36 = vld [vmem:[%s2984_s0 + $0x38] sm:$0xff]  ;;  %501 = vmatprep.mubr.bf16.mxu0 %v60_v33  ;;  %v55_v40 = vld [vmem:[%s2984_s0 + $0x50] sm:$0xff]  ;;  %v2139_v42 = vld [vmem:[%s2983_s1 + $0x100] sm:$0xff]  }
   0xe   :  { %1912 = vmatprep.subr.bf16.mxu1 %v2120_v14  ;;  %v59_v37 = vpack.c.bf16 %v52_v36, %v45_v35  ;;  %v48_v39 = vld [vmem:[%s2984_s0 + $0x18] sm:$0xff]  ;;  %v47_v44 = vld [vmem:[%s2984_s0 + $0x10] sm:$0xff]  ;;  %v54_v45 = vld [vmem:[%s2984_s0 + $0x48] sm:$0xff] }
   0xf   :  { %1891 = vmatpush3.bf16.msra.mxu0 %v2119_v13  ;;  %v62_v41 = vpack.c.bf16 %v55_v40, %v48_v39  ;;  %v61_v46 = vpack.c.bf16 %v54_v45, %v47_v44  ;;  %v2140_v47 = vld [vmem:[%s2983_s1 + $0x148] sm:$0xff]   ;;  %v2142_v49 = vld [vmem:[%s2983_s1 + $0x150] sm:$0xff]   ;;  %v2144_v51 = vld [vmem:[%s2983_s1 + $0x158] sm:$0xff]  }
  0x10   :  { %1892 = vmatprep.subr.bf16.mxu0 %v2122_v16  ;;  %v2141_v48 = vld [vmem:[%s2983_s1 + $0x108] sm:$0xff]   ;;  %v2143_v50 = vld [vmem:[%s2983_s1 + $0x110] sm:$0xff]   ;;  %v2145_v52 = vld [vmem:[%s2983_s1 + $0x118] sm:$0xff]  }
  0x11   :  { %1913 = vmatpush3.bf16.msra.mxu1 %v2121_v15  ;;  %542 = vmatprep.mubr.bf16.mxu1 %v62_v41  ;;  %v2146_v53 = vld [vmem:[%s2983_s1 + $0x160] sm:$0xff]   ;;  %v2148_v55 = vld [vmem:[%s2983_s1 + $0x168] sm:$0xff]   ;;  %v51_v61 = vld [vmem:[%s2984_s0 + $0x30] sm:$0xff] }
  0x12   :  { %1914 = vmatprep.subr.bf16.mxu1 %v2124_v18  ;;  %v2147_v54 = vld [vmem:[%s2983_s1 + $0x120] sm:$0xff]   ;;  %v50_v57 = vld [vmem:[%s2984_s0 + $0x28] sm:$0xff]  ;;  %v2150_v63 = vld [vmem:[%s2983_s1 + $0x170] sm:$0xff]  }
  0x13   :  { %1893 = vmatpush3.bf16.msra.mxu0 %v2123_v17  ;;  %v2154_v56 = vld [vmem:[%s2983_s1 + $0x180] sm:$0xff]   ;;  %v2149_v59 = vld [vmem:[%s2983_s1 + $0x128] sm:$0xff]   ;;  %v2151_v1 = vld [vmem:[%s2983_s1 + $0x130] sm:$0xff]  }
  0x14   :  { %1894 = vmatprep.subr.bf16.mxu0 %v2126_v20  ;;  %v57_v58 = vld [vmem:[%s2984_s0 + $0x60] sm:$0xff]  ;;  %v58_v62 = vld [vmem:[%s2984_s0 + $0x68] sm:$0xff]  ;;  %v2152_v2 = vld [vmem:[%s2983_s1 + $0x178] sm:$0xff]  }
  0x15   :  { %1915 = vmatpush3.bf16.msra.mxu1 %v2125_v19  ;;  %v64_v60 = vpack.c.bf16 %v57_v58, %v50_v57  ;;  %v65_v0 = vpack.c.bf16 %v58_v62, %v51_v61  ;;  %v2153_v3 = vld [vmem:[%s2983_s1 + $0x138] sm:$0xff]   ;;  %v49_v4 = vld [vmem:[%s2984_s0 + $0x20] sm:$0xff]  ;;  %v2156_v8 = vld [vmem:[%s2985_s3 + $0x8] sm:$0xff]  }
  0x16   :  { %1916 = vmatprep.subr.bf16.mxu1 %v2128_v22  ;;  %v56_v5 = vld [vmem:[%s2984_s0 + $0x58] sm:$0xff]  ;;  %v2155_v7 = vld [vmem:[%s2985_s3] sm:$0xff]   ;;  %v2157_v9 = vld [vmem:[%s2985_s3 + $0x10] sm:$0xff]  }
  0x17   :  { %1895 = vmatpush3.bf16.msra.mxu0 %v2127_v21  ;;  %v63_v6 = vpack.c.bf16 %v56_v5, %v49_v4  ;;  %v2158_v10 = vld [vmem:[%s2985_s3 + $0x18] sm:$0xff]   ;;  %v2159_v11 = vld [vmem:[%s2985_s3 + $0x20] sm:$0xff]   ;;  %v2160_v12 = vld [vmem:[%s2985_s3 + $0x28] sm:$0xff]  }
  0x18   :  { %1896 = vmatprep.subr.bf16.mxu0 %v2130_v24  ;;  %v2161_v13 = vld [vmem:[%s2985_s3 + $0x30] sm:$0xff]   ;;  %v2162_v14 = vld [vmem:[%s2985_s3 + $0x38] sm:$0xff]   ;;  %v2163_v15 = vld [vmem:[%s2986_s5] sm:$0xff]  }
  0x19   :  { %1917 = vmatpush3.bf16.msra.mxu1 %v2129_v23  ;;  %v2164_v16 = vld [vmem:[%s2986_s5 + $0x8] sm:$0xff]   ;;  %v2165_v17 = vld [vmem:[%s2986_s5 + $0x10] sm:$0xff]   ;;  %v2166_v18 = vld [vmem:[%s2986_s5 + $0x18] sm:$0xff]  }
  0x1a   :  { %1918 = vmatprep.subr.bf16.mxu1 %v2132_v26  ;;  %v2167_v19 = vld [vmem:[%s2986_s5 + $0x20] sm:$0xff]   ;;  %v2168_v20 = vld [vmem:[%s2986_s5 + $0x28] sm:$0xff]   ;;  %v2170_v57 = vld [vmem:[%s2986_s5 + $0x38] sm:$0xff]  }
  0x1b   :  { %1897 = vmatpush3.bf16.msra.mxu0 %v2131_v25  ;;  %v1741_v22 = vld [vmem:[%s2987_s2] ss:$0 sm:$0xff]  ;;  %v2174_v61 = vld [vmem:[%s2988_s7 + $0x18] sm:$0xff]  }
  0x1c   :  { %1898 = vmatprep.subr.bf16.mxu0 %v2134_v28  ;;  %v2171_v58 = vld [vmem:[%s2988_s7] sm:$0xff]  }
  0x1d   :  { %1919 = vmatpush3.bf16.msra.mxu1 %v2133_v27  ;;  %v2175_v62 = vld [vmem:[%s2988_s7 + $0x20] sm:$0xff]  }
  0x1e   :  { %1920 = vmatprep.subr.bf16.mxu1 %v2136_v30 }
  0x1f   :  { %1899 = vmatpush3.bf16.msra.mxu0 %v2135_v29 }
  0x20   :  { %1928 = vmatprep.subr.bf16.mxu0 %v2138_v38 }
  0x21   :  { %1921 = vmatpush3.bf16.msra.mxu1 %v2137_v34 }
  0x22   :  { %1997 = vmatprep.subr.bf16.mxu1 %v2323_v43  ;;  %502 = vmatmul.mubr.bf16.vlgmr.msra.gmra.mrb[0].mxu0 %v59_v37 }
  0x23   :  { %1929 = vmatpush3.bf16.msra.mxu0 %v2139_v42  ;;  %583 = vmatprep.mubr.bf16.mxu0 %v64_v60  ;;  %v2173_v60 = vld [vmem:[%s2988_s7 + $0x10] sm:$0xff]  }
  0x24   :  { %543 = vmatmul.mubr.bf16.vlgmr.msra.gmra.mrb[0].mxu1 %v61_v46  ;;  %1930 = vmatprep.subr.bf16.mxu0 %v2140_v47 }
  0x25   :  { %1999 = vmatprep.mubr.msk.bf16.mxu1 %vm2324_vm0, %v2323_v43  ;;  %1998 = vmatpush3.bf16.msra.mxu1 %v2154_v56  ;;  %v2169_v56 = vld [vmem:[%s2986_s5 + $0x30] sm:$0xff]  }
  0x26   :  { %2003 = vmatprep.subr.bf16.mxu1 %v2323_v43 }
  0x27   :  { %1931 = vmatpush3.bf16.msra.mxu0 %v2141_v48 }
  0x28   :  { %1932 = vmatprep.subr.bf16.mxu0 %v2142_v49 }
  0x2b   :  { %1933 = vmatpush3.bf16.msra.mxu0 %v2143_v50 }
  0x2c   :  { %1934 = vmatprep.subr.bf16.mxu0 %v2144_v51  ;;  %2000 = vmatmul.mubr.msk.bf16.vlgmr.msra.gmra.mrb[4].mxu1 %vm465_vm1, %v65_v0  ;;  %v1792_v0 = vld [vmem:[%s2989_s4] ss:$0 sm:$0xff] }
  0x2d   :  { %2019 = vmatprep.mubr.msk.bf16.mxu1 %vm2324_vm0, %v2323_v43  ;;  %2004 = vmatpush3.bf16.msra.mxu1 %v2155_v7 }
  0x2e   :  { %2005 = vmatprep.subr.bf16.mxu1 %v2323_v43 }
  0x2f   :  { %1935 = vmatpush3.bf16.msra.mxu0 %v2145_v52 }
  0x30   :  { %1936 = vmatprep.subr.bf16.mxu0 %v2146_v53 }
  0x31   :  { %2006 = vmatpush3.bf16.msra.mxu1 %v2156_v8 }
  0x32   :  { %2007 = vmatprep.subr.bf16.mxu1 %v2323_v43 }
  0x33   :  { %1937 = vmatpush3.bf16.msra.mxu0 %v2147_v54 }
  0x34   :  { %1938 = vmatprep.subr.bf16.mxu0 %v2148_v55 }
  0x35   :  { %2008 = vmatpush3.bf16.msra.mxu1 %v2157_v9 }
  0x36   :  { %2009 = vmatprep.subr.bf16.mxu1 %v2323_v43 }
  0x37   :  { %1939 = vmatpush3.bf16.msra.mxu0 %v2149_v59  ;;  %v2172_v59 = vld [vmem:[%s2988_s7 + $0x8] sm:$0xff]  }
  0x38   :  { %1940 = vmatprep.subr.bf16.mxu0 %v2150_v63  ;;  %v2176_v63 = vld [vmem:[%s2988_s7 + $0x28] sm:$0xff]  }
  0x39   :  { %2010 = vmatpush3.bf16.msra.mxu1 %v2158_v10  ;;  %v2177_v10 = vld [vmem:[%s2988_s7 + $0x30] sm:$0xff]  }
  0x3a   :  { %2011 = vmatprep.subr.bf16.mxu1 %v2323_v43 }
  0x3b   :  { %1941 = vmatpush3.bf16.msra.mxu0 %v2151_v1 }
  0x3c   :  { %1942 = vmatprep.subr.bf16.mxu0 %v2152_v2 }
  0x3d   :  { %2012 = vmatpush3.bf16.msra.mxu1 %v2159_v11  ;;  %v2178_v11 = vld [vmem:[%s2988_s7 + $0x38] sm:$0xff]  }
  0x3e   :  { %2013 = vmatprep.subr.bf16.mxu1 %v2323_v43 }
  0x3f   :  { %1943 = vmatpush3.bf16.msra.mxu0 %v2153_v3 }
  0x40   :  { %2023 = vmatprep.subr.bf16.mxu0 %v2323_v43 }
  0x41   :  { %2014 = vmatpush3.bf16.msra.mxu1 %v2160_v12  ;;  %v2179_v12 = vld [vmem:[%s2990_s9] sm:$0xff]  }
  0x42   :  { %584 = vmatmul.mubr.bf16.vlgmr.msra.gmra.mrb[4].mxu0 %v63_v6  ;;  %2015 = vmatprep.subr.bf16.mxu1 %v2323_v43 }
  0x43   :  { %2039 = vmatprep.mubr.msk.bf16.mxu0 %vm2324_vm0, %v2323_v43  ;;  %2024 = vmatpush3.bf16.msra.mxu0 %v2163_v15  ;;  %v2182_v15 = vld [vmem:[%s2990_s9 + $0x18] sm:$0xff]  }
  0x44   :  { %2025 = vmatprep.subr.bf16.mxu0 %v2323_v43 }
  0x45   :  { %2016 = vmatpush3.bf16.msra.mxu1 %v2161_v13  ;;  %v2180_v13 = vld [vmem:[%s2990_s9 + $0x8] sm:$0xff]  }
  0x46   :  { %2017 = vmatprep.subr.bf16.mxu1 %v2323_v43 }
  0x47   :  { %2026 = vmatpush3.bf16.msra.mxu0 %v2164_v16  ;;  %v2183_v16 = vld [vmem:[%s2990_s9 + $0x20] sm:$0xff]  }
  0x48   :  { %2027 = vmatprep.subr.bf16.mxu0 %v2323_v43 }
  0x49   :  { %2018 = vmatpush3.bf16.msra.mxu1 %v2162_v14  ;;  %v2181_v14 = vld [vmem:[%s2990_s9 + $0x10] sm:$0xff]  }
  0x4a   :  { %2043 = vmatprep.subr.bf16.mxu1 %v2323_v43 }
  0x4b   :  { %2028 = vmatpush3.bf16.msra.mxu0 %v2165_v17  ;;  %v2184_v17 = vld [vmem:[%s2990_s9 + $0x28] sm:$0xff]  }
  0x4c   :  { %2029 = vmatprep.subr.bf16.mxu0 %v2323_v43 }
  0x4f   :  { %2030 = vmatpush3.bf16.msra.mxu0 %v2166_v18  ;;  %v1801_v18 = vld [vmem:[%s2991_s6] ss:$0 sm:$0xff] }
  0x50   :  { %2031 = vmatprep.subr.bf16.mxu0 %v2323_v43 }
  0x53   :  { %2032 = vmatpush3.bf16.msra.mxu0 %v2167_v19 }
  0x54   :  { %2033 = vmatprep.subr.bf16.mxu0 %v2323_v43 }
  0x57   :  { %2034 = vmatpush3.bf16.msra.mxu0 %v2168_v20 }
  0x58   :  { %2035 = vmatprep.subr.bf16.mxu0 %v2323_v43 }
  0x5b   :  { %2036 = vmatpush3.bf16.msra.mxu0 %v2169_v56  ;;  %v2202_v56 = vld [vmem:[%s2992_s11 + $0x78] ss:$28 sps:$4 sm:$0xff]  }
  0x5c   :  { %2037 = vmatprep.subr.bf16.mxu0 %v2323_v43 }
  0x5f   :  { %2038 = vmatpush3.bf16.msra.mxu0 %v2170_v57  ;;  %v2210_v57 = vld [vmem:[%s2992_s11 + $0xb4] ss:$28 sps:$4 sm:$0xff]  }
  0x60   :  { %2063 = vmatprep.subr.bf16.mxu0 %v2323_v43 }
  0xf5   :  { %v1900_v21 = vpop.f32.mrb[0].mxu0 }
  0xf6   :  { %v1901_v23 = vpop.f32.mrb[1].mxu0 }
  0xf7   :  { %v1902_v24 = vadd.f32 %v1901_v23, %v1900_v21  ;;  %v1903_v25 = vpop.f32.mrb[2].mxu0  ;;  %v1922_v26 = vpop.f32.mrb[0].mxu1 }
  0xf8   :  { %v1904_v27 = vpop.f32.mrb[3].mxu0  ;;  %v1923_v30 = vpop.f32.mrb[1].mxu1 }
  0xf9   :  { %v504_v28 = vadd.f32 %v1902_v24, %v1741_v22  ;;  %v1905_v29 = vadd.f32 %v1904_v27, %v1903_v25  ;;  %v1924_v31 = vadd.f32 %v1923_v30, %v1922_v26  ;;  %v1925_v32 = vpop.f32.mrb[2].mxu1  ;;  %v2185_v26 = vld [vmem:[%s2990_s9 + $0x30] sm:$0xff]   ;;  %v2186_v27 = vld [vmem:[%s2990_s9 + $0x38] sm:$0xff]   ;;  %v2192_v30 = vld [vmem:[%s2992_s11 + $0xc] ss:$28 sps:$4 sm:$0xff]  }
  0xfa   :  { %v1926_v34 = vpop.f32.mrb[3].mxu1 }
  0xfb   :  { %v507_v33 = vadd.f32 %v1905_v29, %v1741_v22  ;;  %v545_v35 = vadd.f32 %v1924_v31, %v504_v28  ;;  %v1927_v36 = vadd.f32 %v1926_v34, %v1925_v32  ;;  %v2187_v28 = vld [vmem:[%s2992_s11] ss:$28 sps:$4 sm:$0xff]   ;;  %v2193_v32 = vld [vmem:[%s2992_s11 + $0x38] ss:$28 sps:$4 sm:$0xff]   ;;  %v2199_v34 = vld [vmem:[%s2992_s11 + $0x70] ss:$28 sps:$4 sm:$0xff]  }
  0xfc   :  { %v2189_v29 = vld [vmem:[%s2992_s11 + $0x4] ss:$28 sps:$4 sm:$0xff]   ;;  %v2195_v31 = vld [vmem:[%s2992_s11 + $0x3c] ss:$28 sps:$4 sm:$0xff]  }
  0xfd   :  { %v548_v37 = vadd.f32 %v1927_v36, %v507_v33  ;;  %v2201_v33 = vld [vmem:[%s2992_s11 + $0x74] ss:$28 sps:$4 sm:$0xff]   ;;  %v2205_v36 = vld [vmem:[%s2992_s11 + $0xa8] ss:$28 sps:$4 sm:$0xff]  }
  0xff   :  { %v626_v38 = vpop.f32.mrb[4].mxu1 }
 0x100   :  { %v2001_v39 = vpop.f32.mrb[5].mxu1 }
 0x101   :  { %v629_v40 = vpop.f32.mrb[6].mxu1  ;;  %v2219_v39 = vld [vmem:[%s2992_s11 + $0x11c] ss:$28 sps:$4 sm:$0xff]  }
 0x102   :  { %v2002_v41 = vpop.f32.mrb[7].mxu1 }
 0x103   :  { %v1810_v41 = vld [vmem:[%s2993_s8] ss:$0 sm:$0xff] }
 0x115   :  { %v1944_v42 = vpop.f32.mrb[4].mxu0 }
 0x116   :  { %v1945_v44 = vpop.f32.mrb[5].mxu0 }
 0x117   :  { %v1946_v45 = vadd.f32 %v1945_v44, %v1944_v42  ;;  %v1947_v46 = vpop.f32.mrb[6].mxu0 }
 0x118   :  { %v1948_v47 = vpop.f32.mrb[7].mxu0 }
 0x119   :  { %v586_v48 = vadd.f32 %v1946_v45, %v545_v35  ;;  %v1949_v49 = vadd.f32 %v1948_v47, %v1947_v46  ;;  %v2207_v35 = vld [vmem:[%s2992_s11 + $0xac] ss:$28 sps:$4 sm:$0xff]  }
 0x11b   :  { %v627_v50 = vadd.f32 %v626_v38, %v586_v48  ;;  %v589_v51 = vadd.f32 %v1949_v49, %v548_v37  ;;  %v2213_v37 = vld [vmem:[%s2992_s11 + $0xe4] ss:$28 sps:$4 sm:$0xff]  }
 0x11c   :  { %v2211_v38 = vld [vmem:[%s2992_s11 + $0xe0] ss:$28 sps:$4 sm:$0xff]  }
 0x11d   :  { %v630_v52 = vadd.f32 %v629_v40, %v589_v51  ;;  %v633_v53 = vmax.f32 %v627_v50, 0.0  ;;  %v2217_v40 = vld [vmem:[%s2992_s11 + $0x118] ss:$28 sps:$4 sm:$0xff]   ;;  %v2190_v51 = vld [vmem:[%s2992_s11 + $0x8] ss:$28 sps:$4 sm:$0xff]  }
 0x11f   :  { %v634_v54 = vmax.f32 %v630_v52, 0.0 }
 0x121   :  { %v635_v55 = vpack.c.bf16 %v634_v54, %v633_v53  ;;  %v2198_v53 = vld [vmem:[%s2992_s11 + $0x44] ss:$28 sps:$4 sm:$0xff]  }
 0x122   :  { %v2196_v54 = vld [vmem:[%s2992_s11 + $0x40] ss:$28 sps:$4 sm:$0xff]  }
 0x123   :  { %2020 = vmatmul.mubr.bf16.vlgmr.msra.gmra.mrb[8].mxu1 %v635_v55  ;;  %v2204_v55 = vld [vmem:[%s2992_s11 + $0x7c] ss:$28 sps:$4 sm:$0xff]  }
 0x124   :  { %2059 = vmatprep.mubr.msk.bf16.mxu1 %vm2324_vm0, %v2323_v43  ;;  %2044 = vmatpush3.bf16.msra.mxu1 %v2171_v58  ;;  %v2208_v58 = vld [vmem:[%s2992_s11 + $0xb0] ss:$28 sps:$4 sm:$0xff]  }
 0x125   :  { %2045 = vmatprep.subr.bf16.mxu1 %v2323_v43 }
 0x128   :  { %2046 = vmatpush3.bf16.msra.mxu1 %v2172_v59  ;;  %v2216_v59 = vld [vmem:[%s2992_s11 + $0xec] ss:$28 sps:$4 sm:$0xff]  }
 0x129   :  { %2047 = vmatprep.subr.bf16.mxu1 %v2323_v43 }
 0x12c   :  { %2048 = vmatpush3.bf16.msra.mxu1 %v2173_v60  ;;  %v2214_v60 = vld [vmem:[%s2992_s11 + $0xe8] ss:$28 sps:$4 sm:$0xff]  }
 0x12d   :  { %2049 = vmatprep.subr.bf16.mxu1 %v2323_v43 }
 0x130   :  { %2050 = vmatpush3.bf16.msra.mxu1 %v2174_v61  ;;  %v2222_v61 = vld [vmem:[%s2992_s11 + $0x124] ss:$28 sps:$4 sm:$0xff]  }
 0x131   :  { %2051 = vmatprep.subr.bf16.mxu1 %v2323_v43 }
 0x134   :  { %2052 = vmatpush3.bf16.msra.mxu1 %v2175_v62  ;;  %v2220_v62 = vld [vmem:[%s2992_s11 + $0x120] ss:$28 sps:$4 sm:$0xff]  }
 0x135   :  { %2053 = vmatprep.subr.bf16.mxu1 %v2323_v43 }
 0x138   :  { %2054 = vmatpush3.bf16.msra.mxu1 %v2176_v63  ;;  %v2225_v63 = vld [vmem:[%s2992_s11 + $0x154] ss:$28 sps:$4 sm:$0xff]  }
 0x139   :  { %2055 = vmatprep.subr.bf16.mxu1 %v2323_v43 }
 0x13c   :  { %2056 = vmatpush3.bf16.msra.mxu1 %v2177_v10 }
 0x13d   :  { %2057 = vmatprep.subr.bf16.mxu1 %v2323_v43 }
 0x140   :  { %2058 = vmatpush3.bf16.msra.mxu1 %v2178_v11 }
 0x141   :  { %1483 = vmatprep.subr.bf16.mxu1 %v2189_v29  ;;  %v2250_v29 = vld [vmem:[%s2992_s11 + $0xc0] ss:$28 sps:$4 sm:$0xff]  }
 0x1f6   :  { %v741_v1 = vpop.f32.mrb[8].mxu1 }
 0x1f7   :  { %v742_v2 = vadd.f32 %v1792_v0, %v741_v1  ;;  %v2021_v3 = vpop.f32.mrb[9].mxu1  ;;  %v2223_v1 = vld [vmem:[%s2992_s11 + $0x150] ss:$28 sps:$4 sm:$0xff]  }
 0x1f8   :  { %v744_v4 = vpop.f32.mrb[10].mxu1  ;;  %v2231_v3 = vld [vmem:[%s2992_s11 + $0x18c] ss:$28 sps:$4 sm:$0xff]  }
 0x1f9   :  { %v745_v5 = vadd.f32 %v1792_v0, %v744_v4  ;;  %v2022_v6 = vpop.f32.mrb[11].mxu1  ;;  %v748_v7 = vmax.f32 %v742_v2, 0.0  ;;  %v2228_v0 = vld [vmem:[%s2992_s11 + $0x15c] ss:$28 sps:$4 sm:$0xff]   ;;  %v2234_v4 = vld [vmem:[%s2992_s11 + $0x194] ss:$28 sps:$4 sm:$0xff]  }
 0x1fa   :  { %v2226_v2 = vld [vmem:[%s2992_s11 + $0x158] ss:$28 sps:$4 sm:$0xff]   ;;  %v2232_v6 = vld [vmem:[%s2992_s11 + $0x190] ss:$28 sps:$4 sm:$0xff]  }
 0x1fb   :  { %v749_v8 = vmax.f32 %v745_v5, 0.0  ;;  %v2229_v5 = vld [vmem:[%s2992_s11 + $0x188] ss:$28 sps:$4 sm:$0xff]  }
 0x1fd   :  { %v750_v9 = vpack.c.bf16 %v749_v8, %v748_v7  ;;  %v2237_v7 = vld [vmem:[%s2992_s11 + $0x14] ss:$28 sps:$4 sm:$0xff]   ;;  %v2325_v8 = vmov 0  }
 0x1ff   :  { %2040 = vmatmul.mubr.bf16.vlgmr.msra.gmra.mrb[8].mxu0 %v750_v9  ;;  %v1819_v9 = vld [vmem:[%s2994_s10] ss:$0 sm:$0xff] }
 0x200   :  { %2079 = vmatprep.mubr.msk.bf16.mxu0 %vm2324_vm0, %v2323_v43  ;;  %2064 = vmatpush3.bf16.msra.mxu0 %v2179_v12 }
 0x201   :  { %2065 = vmatprep.subr.bf16.mxu0 %v2323_v43 }
 0x204   :  { %2066 = vmatpush3.bf16.msra.mxu0 %v2180_v13 }
 0x205   :  { %2067 = vmatprep.subr.bf16.mxu0 %v2323_v43 }
 0x208   :  { %2068 = vmatpush3.bf16.msra.mxu0 %v2181_v14 }
 0x209   :  { %2069 = vmatprep.subr.bf16.mxu0 %v2323_v43 }
 0x20c   :  { %2070 = vmatpush3.bf16.msra.mxu0 %v2182_v15 }
 0x20d   :  { %2071 = vmatprep.subr.bf16.mxu0 %v2323_v43 }
 0x210   :  { %2072 = vmatpush3.bf16.msra.mxu0 %v2183_v16 }
 0x211   :  { %2073 = vmatprep.subr.bf16.mxu0 %v2323_v43 }
 0x214   :  { %2074 = vmatpush3.bf16.msra.mxu0 %v2184_v17 }
 0x215   :  { %2075 = vmatprep.subr.bf16.mxu0 %v2323_v43 }
 0x218   :  { %2076 = vmatpush3.bf16.msra.mxu0 %v2185_v26  ;;  %v2246_v26 = vld [vmem:[%s2992_s11 + $0x88] ss:$28 sps:$4 sm:$0xff]  }
 0x219   :  { %2077 = vmatprep.subr.bf16.mxu0 %v2323_v43 }
 0x21c   :  { %2078 = vmatpush3.bf16.msra.mxu0 %v2186_v27  ;;  %v2249_v27 = vld [vmem:[%s2992_s11 + $0xbc] ss:$28 sps:$4 sm:$0xff]  }
 0x21d   :  { %1526 = vmatprep.subr.bf16.mxu0 %v2192_v30  ;;  %v2253_v30 = vld [vmem:[%s2992_s11 + $0xf4] ss:$28 sps:$4 sm:$0xff]  }
 0x2d2   :  { %v856_v19 = vpop.f32.mrb[8].mxu0 }
 0x2d3   :  { %v2041_v20 = vpop.f32.mrb[9].mxu0  ;;  %v857_v22 = vadd.f32 %v1801_v18, %v856_v19  ;;  %v2238_v19 = vld [vmem:[%s2992_s11 + $0x18] ss:$28 sps:$4 sm:$0xff]  }
 0x2d4   :  { %v859_v21 = vpop.f32.mrb[10].mxu0 }
 0x2d5   :  { %v860_v23 = vadd.f32 %v1801_v18, %v859_v21  ;;  %v2042_v24 = vpop.f32.mrb[11].mxu0  ;;  %v2235_v18 = vld [vmem:[%s2992_s11 + $0x10] ss:$28 sps:$4 sm:$0xff]  }
 0x2d6   :  { %v2241_v21 = vld [vmem:[%s2992_s11 + $0x4c] ss:$28 sps:$4 sm:$0xff]   ;;  %v2245_v24 = vld [vmem:[%s2992_s11 + $0x84] ss:$28 sps:$4 sm:$0xff]  }
 0x2d7   :  { %v863_v25 = vpack.c.bf16 %v860_v23, %v857_v22  ;;  %v2239_v22 = vld [vmem:[%s2992_s11 + $0x48] ss:$28 sps:$4 sm:$0xff]   ;;  %v2242_v23 = vld [vmem:[%s2992_s11 + $0x50] ss:$28 sps:$4 sm:$0xff]  }
 0x2d9   :  { %2060 = vmatmul.mubr.bf16.vlgmr.msra.gmra.mrb[12].mxu1 %v863_v25  ;;  %v2243_v25 = vld [vmem:[%s2992_s11 + $0x80] ss:$28 sps:$4 sm:$0xff]  }
 0x2da   :  { %1484 = vmatpush1.bf16.msra.mxu1 %v2187_v28  ;;  %1515 = vmatprep.mubr.bf16.mxu1 %v2325_v8  ;;  %v2247_v28 = vld [vmem:[%s2992_s11 + $0xb8] ss:$28 sps:$4 sm:$0xff]  }
 0x2db   :  { %1485 = vmatprep.subr.bf16.mxu1 %v2195_v31  ;;  %v2251_v31 = vld [vmem:[%s2992_s11 + $0xf0] ss:$28 sps:$4 sm:$0xff]  }
 0x2de   :  { %1486 = vmatpush1.bf16.msra.mxu1 %v2193_v32  ;;  %v2254_v32 = vld [vmem:[%s2992_s11 + $0xf8] ss:$28 sps:$4 sm:$0xff]  }
 0x2df   :  { %1487 = vmatprep.subr.bf16.mxu1 %v2201_v33  ;;  %v2257_v33 = vld [vmem:[%s2992_s11 + $0x12c] ss:$28 sps:$4 sm:$0xff]  }
 0x2e2   :  { %1488 = vmatpush1.bf16.msra.mxu1 %v2199_v34  ;;  %v2255_v34 = vld [vmem:[%s2992_s11 + $0x128] ss:$28 sps:$4 sm:$0xff]  }
 0x2e3   :  { %1489 = vmatprep.subr.bf16.mxu1 %v2207_v35  ;;  %v2258_v35 = vld [vmem:[%s2992_s11 + $0x130] ss:$28 sps:$4 sm:$0xff]  }
 0x2e6   :  { %1490 = vmatpush1.bf16.msra.mxu1 %v2205_v36  ;;  %v2261_v36 = vld [vmem:[%s2992_s11 + $0x164] ss:$28 sps:$4 sm:$0xff]  }
 0x2e7   :  { %1491 = vmatprep.subr.bf16.mxu1 %v2213_v37  ;;  %v2259_v37 = vld [vmem:[%s2992_s11 + $0x160] ss:$28 sps:$4 sm:$0xff]  }
 0x2ea   :  { %1492 = vmatpush1.bf16.msra.mxu1 %v2211_v38  ;;  %v2262_v38 = vld [vmem:[%s2992_s11 + $0x168] ss:$28 sps:$4 sm:$0xff]  }
 0x2eb   :  { %1493 = vmatprep.subr.bf16.mxu1 %v2219_v39  ;;  %v2265_v39 = vld [vmem:[%s2992_s11 + $0x19c] ss:$28 sps:$4 sm:$0xff]  }
 0x2ee   :  { %1494 = vmatpush1.bf16.msra.mxu1 %v2217_v40  ;;  %v2263_v40 = vld [vmem:[%s2992_s11 + $0x198] ss:$28 sps:$4 sm:$0xff]  }
 0x2ef   :  { %1495 = vmatprep.subr.bf16.mxu1 %v2225_v63 }
 0x2f2   :  { %1496 = vmatpush1.bf16.msra.mxu1 %v2223_v1 }
 0x2f3   :  { %1497 = vmatprep.subr.bf16.mxu1 %v2231_v3 }
 0x2f6   :  { %1498 = vmatpush1.bf16.msra.mxu1 %v2229_v5 }
 0x2f7   :  { %1569 = vmatprep.subr.bf16.mxu1 %v2237_v7 }
 0x3ac   :  { %v969_v42 = vpop.f32.mrb[12].mxu1 }
 0x3ad   :  { %v970_v44 = vadd.f32 %v1810_v41, %v969_v42  ;;  %v2061_v45 = vpop.f32.mrb[13].mxu1  ;;  %v1160_v42 = vlaneseq }
 0x3ae   :  { %v972_v46 = vpop.f32.mrb[14].mxu1 }
 0x3af   :  { %v973_v47 = vadd.f32 %v1810_v41, %v972_v46  ;;  %v2062_v48 = vpop.f32.mrb[15].mxu1  ;;  %v976_v49 = vmax.f32 %v970_v44, 0.0  ;;  %v2266_v41 = vld [vmem:[%s2992_s11 + $0x1a0] ss:$28 sps:$4 sm:$0xff]   ;;  %v2918_v44 = vshrl.u32 %v1160_v42, 7 }
 0x3b1   :  { %v977_v50 = vmax.f32 %v973_v47, 0.0  ;;  %v1162_v45 = vsub.s32 0, %v2918_v44  ;;  %v1170_v46 = vsub.s32 2, %v2918_v44  ;;  %v2925_v47 = vld [vmem:[%s2995_s12] sm:$0x7f]  ;;  %v1166_v48 = vsub.s32 1, %v2918_v44 }
 0x3b3   :  { %v978_v52 = vpack.c.bf16 %v977_v50, %v976_v49  ;;  %v1163_v49 = vrot.slane %v2925_v47, %v1162_v45  ;;  %v1171_v50 = vrot.slane %v2925_v47, %v1170_v46 }
 0x3b5   :  { %2080 = vmatmul.mubr.bf16.vlgmr.msra.gmra.mrb[12].mxu0 %v978_v52 }
 0x3b6   :  { %1527 = vmatpush1.bf16.msra.mxu0 %v2190_v51  ;;  %1558 = vmatprep.mubr.bf16.mxu0 %v2325_v8  ;;  %v1167_v51 = vrot.slane %v2925_v47, %v1166_v48 }
 0x3b7   :  { %1528 = vmatprep.subr.bf16.mxu0 %v2198_v53 }
 0x3ba   :  { %1529 = vmatpush1.bf16.msra.mxu0 %v2196_v54 }
 0x3bb   :  { %1530 = vmatprep.subr.bf16.mxu0 %v2204_v55 }
 0x3be   :  { %1531 = vmatpush1.bf16.msra.mxu0 %v2202_v56 }
 0x3bf   :  { %1532 = vmatprep.subr.bf16.mxu0 %v2210_v57 }
 0x3c2   :  { %1533 = vmatpush1.bf16.msra.mxu0 %v2208_v58 }
 0x3c3   :  { %1534 = vmatprep.subr.bf16.mxu0 %v2216_v59 }
 0x3c6   :  { %1535 = vmatpush1.bf16.msra.mxu0 %v2214_v60 }
 0x3c7   :  { %1536 = vmatprep.subr.bf16.mxu0 %v2222_v61 }
 0x3ca   :  { %1537 = vmatpush1.bf16.msra.mxu0 %v2220_v62 }
 0x3cb   :  { %1538 = vmatprep.subr.bf16.mxu0 %v2228_v0 }
 0x3ce   :  { %1539 = vmatpush1.bf16.msra.mxu0 %v2226_v2 }
 0x3cf   :  { %1540 = vmatprep.subr.bf16.mxu0 %v2234_v4 }
 0x3d2   :  { %1541 = vmatpush1.bf16.msra.mxu0 %v2232_v6 }
 0x3d3   :  { %2083 = vmatprep.subr.bf16.mxu0 %v2323_v43 }
 0x488   :  { %v1084_v10 = vpop.f32.mrb[12].mxu0 }
 0x489   :  { %v1085_v11 = vadd.f32 %v1819_v9, %v1084_v10  ;;  %v2081_v12 = vpop.f32.mrb[13].mxu0 }
 0x48a   :  { %v1087_v13 = vpop.f32.mrb[14].mxu0 }
 0x48b   :  { %v1088_v14 = vadd.f32 %v1819_v9, %v1087_v13  ;;  %v2082_v15 = vpop.f32.mrb[15].mxu0  ;;  %v1091_v16 = vmax.f32 %v1085_v11, 0.0 }
 0x48d   :  { %v1092_v17 = vmax.f32 %v1088_v14, 0.0 }
 0x48f   :  { %v1093_v20 = vpack.c.bf16 %v1092_v17, %v1091_v16 }
 0x491   :  { %1516 = vmatmul.mubr.bf16.vlgmr.msra.gmra.mrb[16].mxu1 %v1093_v20  ;;  %1559 = vmatmul.mubr.bf16.vlgmr.msra.gmra.mrb[16].mxu0 %v1093_v20 }
 0x492   :  { %1570 = vmatpush1.bf16.msra.mxu1 %v2235_v18  ;;  %2084 = vmatpush3.bf16.msra.mxu0 %v2238_v19 }
 0x493   :  { %1571 = vmatprep.subr.bf16.mxu1 %v2241_v21  ;;  %2085 = vmatprep.subr.bf16.mxu0 %v2323_v43 }
 0x494   :  { %1601 = vmatprep.mubr.bf16.mxu1 %v2325_v8  ;;  %2099 = vmatprep.mubr.msk.bf16.mxu0 %vm2324_vm0, %v2323_v43 }
 0x496   :  { %1572 = vmatpush1.bf16.msra.mxu1 %v2239_v22  ;;  %2086 = vmatpush3.bf16.msra.mxu0 %v2242_v23 }
 0x497   :  { %1573 = vmatprep.subr.bf16.mxu1 %v2245_v24  ;;  %2087 = vmatprep.subr.bf16.mxu0 %v2323_v43 }
 0x49a   :  { %1574 = vmatpush1.bf16.msra.mxu1 %v2243_v25  ;;  %2088 = vmatpush3.bf16.msra.mxu0 %v2246_v26 }
 0x49b   :  { %1575 = vmatprep.subr.bf16.mxu1 %v2249_v27  ;;  %2089 = vmatprep.subr.bf16.mxu0 %v2323_v43 }
 0x49e   :  { %1576 = vmatpush1.bf16.msra.mxu1 %v2247_v28  ;;  %2090 = vmatpush3.bf16.msra.mxu0 %v2250_v29 }
 0x49f   :  { %1577 = vmatprep.subr.bf16.mxu1 %v2253_v30  ;;  %2091 = vmatprep.subr.bf16.mxu0 %v2323_v43 }
 0x4a2   :  { %1578 = vmatpush1.bf16.msra.mxu1 %v2251_v31  ;;  %2092 = vmatpush3.bf16.msra.mxu0 %v2254_v32 }
 0x4a3   :  { %1579 = vmatprep.subr.bf16.mxu1 %v2257_v33  ;;  %2093 = vmatprep.subr.bf16.mxu0 %v2323_v43 }
 0x4a6   :  { %1580 = vmatpush1.bf16.msra.mxu1 %v2255_v34  ;;  %2094 = vmatpush3.bf16.msra.mxu0 %v2258_v35 }
 0x4a7   :  { %1581 = vmatprep.subr.bf16.mxu1 %v2261_v36  ;;  %2095 = vmatprep.subr.bf16.mxu0 %v2323_v43 }
 0x4aa   :  { %1582 = vmatpush1.bf16.msra.mxu1 %v2259_v37  ;;  %2096 = vmatpush3.bf16.msra.mxu0 %v2262_v38  ;;  %v1178_v37 = vsub.s32 4, %v2918_v44  ;;  %v1186_v38 = vsub.s32 6, %v2918_v44 }
 0x4ab   :  { %1583 = vmatprep.subr.bf16.mxu1 %v2265_v39  ;;  %2097 = vmatprep.subr.bf16.mxu0 %v2323_v43  ;;  %v1174_v43 = vsub.s32 3, %v2918_v44  ;;  %v1182_v39 = vsub.s32 5, %v2918_v44 }
 0x4ad   :  { %v1175_v52 = vrot.slane %v2925_v47, %v1174_v43  ;;  %v1183_v45 = vrot.slane %v2925_v47, %v1182_v39 }
 0x4ae   :  { %1584 = vmatpush1.bf16.msra.mxu1 %v2263_v40  ;;  %2098 = vmatpush3.bf16.msra.mxu0 %v2266_v41  ;;  %v1179_v40 = vrot.slane %v2925_v47, %v1178_v37  ;;  %v1187_v41 = vrot.slane %v2925_v47, %v1186_v38 }
 0x4b1   :  { %1602 = vmatmul.mubr.bf16.vlgmr.msra.gmra.mrb[20].mxu1 %v1093_v20  ;;  %2100 = vmatmul.mubr.bf16.vlgmr.msra.gmra.mrb[20].mxu0 %v1093_v20 }
 0x564   :  { %v1517_v53 = vpop.f32.mrb[16].mxu1  ;;  %v1560_v54 = vpop.f32.mrb[16].mxu0 }
 0x565   :  { %v1518_v55 = vadd.f32 %v1517_v53, %v1163_v49  ;;  %v1561_v56 = vadd.f32 %v1560_v54, %v1171_v50  ;;  %v1519_v57 = vpop.f32.mrb[17].mxu1  ;;  %v1562_v58 = vpop.f32.mrb[17].mxu0 }
 0x566   :  { %v1520_v59 = vadd.f32 %v1519_v57, %v1167_v51  ;;  %v1563_v60 = vadd.f32 %v1562_v58, %v1175_v52  ;;  %v1521_v61 = vpop.f32.mrb[18].mxu1  ;;  %v1564_v62 = vpop.f32.mrb[18].mxu0 }
 0x567   :  { %v1653_v63 = vsub.f32 0.0, %v1518_v55  ;;  %v1655_v0 = vsub.f32 0.0, %v1561_v56  ;;  %v1522_v1 = vadd.f32 %v1521_v61, %v1163_v49  ;;  %v1565_v2 = vadd.f32 %v1564_v62, %v1171_v50  ;;  %v1523_v3 = vpop.f32.mrb[19].mxu1  ;;  %v1566_v4 = vpop.f32.mrb[19].mxu0 }
 0x568   :  { %v1654_v5 = vsub.f32 0.0, %v1520_v59  ;;  %v1656_v6 = vsub.f32 0.0, %v1563_v60  ;;  %v1524_v7 = vadd.f32 %v1523_v3, %v1167_v51  ;;  %v1567_v8 = vadd.f32 %v1566_v4, %v1175_v52 }
 0x569   :  { %v1667_v9 = vmul.f32 1.442695, %v1653_v63  ;;  %v1671_v10 = vmul.f32 1.442695, %v1655_v0  ;;  %v1660_v11 = vsub.f32 0.0, %v1522_v1  ;;  %v1662_v12 = vsub.f32 0.0, %v1565_v2 }
 0x56a   :  { %v1669_v13 = vmul.f32 1.442695, %v1654_v5  ;;  %v1673_v14 = vmul.f32 1.442695, %v1656_v6  ;;  %v1661_v15 = vsub.f32 0.0, %v1524_v7  ;;  %v1663_v16 = vsub.f32 0.0, %v1567_v8 }
 0x56b   :  { %2267 = vpow2.f32 %v1667_v9  ;;  %v1681_v17 = vmul.f32 1.442695, %v1660_v11  ;;  %v1685_v18 = vmul.f32 1.442695, %v1662_v12 }
 0x56c   :  { %2269 = vpow2.f32 %v1671_v10  ;;  %v1683_v19 = vmul.f32 1.442695, %v1661_v15  ;;  %v1687_v20 = vmul.f32 1.442695, %v1663_v16 }
 0x56d   :  { %2271 = vpow2.f32 %v1669_v13 }
 0x56e   :  { %2273 = vpow2.f32 %v1673_v14 }
 0x56f   :  { %2275 = vpow2.f32 %v1681_v17 }
 0x570   :  { %2277 = vpow2.f32 %v1685_v18 }
 0x571   :  { %2279 = vpow2.f32 %v1683_v19 }
 0x572   :  { %2281 = vpow2.f32 %v1687_v20 }
 0x575   :  { %v2268_v21 = vpop.eup %2267 }
 0x576   :  { %v2270_v22 = vpop.eup %2269  ;;  %v1695_v23 = vadd.f32 1.0, %v2268_v21 }
 0x577   :  { %v2272_v24 = vpop.eup %2271  ;;  %v1697_v25 = vadd.f32 1.0, %v2270_v22 }
 0x578   :  { %v2274_v26 = vpop.eup %2273  ;;  %2283 = vrcp.f32 %v1695_v23  ;;  %v1696_v27 = vadd.f32 1.0, %v2272_v24 }
 0x579   :  { %v2276_v28 = vpop.eup %2275  ;;  %2285 = vrcp.f32 %v1697_v25  ;;  %v1698_v29 = vadd.f32 1.0, %v2274_v26 }
 0x57a   :  { %v2278_v30 = vpop.eup %2277  ;;  %2287 = vrcp.f32 %v1696_v27  ;;  %v1702_v31 = vadd.f32 1.0, %v2276_v28 }
 0x57b   :  { %v2280_v32 = vpop.eup %2279  ;;  %2289 = vrcp.f32 %v1698_v29  ;;  %v1704_v33 = vadd.f32 1.0, %v2278_v30 }
 0x57c   :  { %v2282_v34 = vpop.eup %2281  ;;  %2291 = vrcp.f32 %v1702_v31  ;;  %v1703_v35 = vadd.f32 1.0, %v2280_v32 }
 0x57d   :  { %2293 = vrcp.f32 %v1704_v33  ;;  %v1705_v36 = vadd.f32 1.0, %v2282_v34 }
 0x57e   :  { %2295 = vrcp.f32 %v1703_v35 }
 0x57f   :  { %2297 = vrcp.f32 %v1705_v36 }
 0x582   :  { %v2284_v42 = vpop.eup %2283 }
 0x583   :  { %v2286_v46 = vpop.eup %2285  ;;  %1723 = vst [vmem:[%s2996_s13] sm:$0xff] %v2284_v42 }
 0x584   :  { %v2288_v48 = vpop.eup %2287  ;;  %1725 = vst [vmem:[%s2996_s13 + $0x10] sm:$0xff] %v2286_v46  ;;  %v1603_v43 = vpop.f32.mrb[20].mxu1 }
 0x585   :  { %v1646_v44 = vpop.f32.mrb[20].mxu0  ;;  %v2290_v49 = vpop.eup %2289  ;;  %1724 = vst [vmem:[%s2996_s13 + $0x8] sm:$0xff] %v2288_v48  ;;  %v1604_v50 = vadd.f32 %v1603_v43, %v1179_v40 }
 0x586   :  { %v1647_v51 = vadd.f32 %v1646_v44, %v1187_v41  ;;  %v1605_v47 = vpop.f32.mrb[21].mxu1  ;;  %v2101_v52 = vpop.f32.mrb[21].mxu0  ;;  %1726 = vst [vmem:[%s2996_s13 + $0x18] sm:$0xff] %v2290_v49 }
 0x587   :  { %v2292_v53 = vpop.eup %2291  ;;  %v1606_v54 = vadd.f32 %v1605_v47, %v1183_v45  ;;  %v1607_v55 = vpop.f32.mrb[22].mxu1  ;;  %v1657_v58 = vsub.f32 0.0, %v1604_v50 }
 0x588   :  { %v1649_v56 = vpop.f32.mrb[22].mxu0  ;;  %v2294_v57 = vpop.eup %2293  ;;  %1730 = vst [vmem:[%s2996_s13 + $0x38] sm:$0xff] %v2292_v53  ;;  %v1659_v59 = vsub.f32 0.0, %v1647_v51  ;;  %v1608_v60 = vadd.f32 %v1607_v55, %v1179_v40 }
 0x589   :  { %v1650_v61 = vadd.f32 %v1649_v56, %v1187_v41  ;;  %v1609_v62 = vpop.f32.mrb[23].mxu1  ;;  %v2102_v63 = vpop.f32.mrb[23].mxu0  ;;  %1732 = vst [vmem:[%s2996_s13 + $0x48] sm:$0xff] %v2294_v57  ;;  %v1658_v1 = vsub.f32 0.0, %v1606_v54  ;;  %v1675_v4 = vmul.f32 1.442695, %v1657_v58 }
 0x58a   :  { %v2296_v0 = vpop.eup %2295  ;;  %v1610_v2 = vadd.f32 %v1609_v62, %v1183_v45  ;;  %v1679_v5 = vmul.f32 1.442695, %v1659_v59  ;;  %v1664_v6 = vsub.f32 0.0, %v1608_v60 }
 0x58b   :  { %v2298_v3 = vpop.eup %2297  ;;  %1731 = vst [vmem:[%s2996_s13 + $0x40] sm:$0xff] %v2296_v0  ;;  %v1666_v7 = vsub.f32 0.0, %v1650_v61  ;;  %v1677_v8 = vmul.f32 1.442695, %v1658_v1  ;;  %2299 = vpow2.f32 %v1675_v4 }
 0x58c   :  { %1733 = vst [vmem:[%s2996_s13 + $0x50] sm:$0xff] %v2298_v3  ;;  %v1665_v9 = vsub.f32 0.0, %v1610_v2  ;;  %v1689_v10 = vmul.f32 1.442695, %v1664_v6  ;;  %2301 = vpow2.f32 %v1679_v5 }
 0x58d   :  { %v1693_v11 = vmul.f32 1.442695, %v1666_v7  ;;  %2303 = vpow2.f32 %v1677_v8 }
 0x58e   :  { %v1691_v12 = vmul.f32 1.442695, %v1665_v9  ;;  %2305 = vpow2.f32 %v1689_v10 }
 0x58f   :  { %2307 = vpow2.f32 %v1693_v11 }
 0x590   :  { %2309 = vpow2.f32 %v1691_v12 }
 0x595   :  { %v2300_v13 = vpop.eup %2299 }
 0x596   :  { %v2302_v14 = vpop.eup %2301  ;;  %v1699_v15 = vadd.f32 1.0, %v2300_v13 }
 0x597   :  { %v2304_v16 = vpop.eup %2303  ;;  %v1701_v17 = vadd.f32 1.0, %v2302_v14 }
 0x598   :  { %v2306_v18 = vpop.eup %2305  ;;  %2311 = vrcp.f32 %v1699_v15  ;;  %v1700_v19 = vadd.f32 1.0, %v2304_v16 }
 0x599   :  { %v2308_v20 = vpop.eup %2307  ;;  %2313 = vrcp.f32 %v1701_v17  ;;  %v1706_v21 = vadd.f32 1.0, %v2306_v18 }
 0x59a   :  { %v2310_v22 = vpop.eup %2309  ;;  %2315 = vrcp.f32 %v1700_v19  ;;  %v1708_v23 = vadd.f32 1.0, %v2308_v20 }
 0x59b   :  { %2317 = vrcp.f32 %v1706_v21  ;;  %v1707_v24 = vadd.f32 1.0, %v2310_v22 }
 0x59c   :  { %2319 = vrcp.f32 %v1708_v23 }
 0x59d   :  { %2321 = vrcp.f32 %v1707_v24 }
 0x5a2   :  { %v2312_v25 = vpop.eup %2311 }
 0x5a3   :  { %v2314_v26 = vpop.eup %2313  ;;  %1727 = vst [vmem:[%s2996_s13 + $0x20] sm:$0xff] %v2312_v25 }
 0x5a4   :  { %v2316_v27 = vpop.eup %2315  ;;  %1729 = vst.msk [vmem:[%s2996_s13 + $0x30] sm:$0xff] %vm465_vm1, %v2314_v26 }
 0x5a5   :  { %v2318_v28 = vpop.eup %2317  ;;  %1728 = vst [vmem:[%s2996_s13 + $0x28] sm:$0xff] %v2316_v27 }
 0x5a6   :  { %v2320_v29 = vpop.eup %2319  ;;  %1734 = vst [vmem:[%s2996_s13 + $0x58] sm:$0xff] %v2318_v28 }
 0x5a7   :  { %v2322_v30 = vpop.eup %2321  ;;  %1736 = vst.msk [vmem:[%s2996_s13 + $0x68] sm:$0xff] %vm465_vm1, %v2320_v29 }
 0x5a8   :  { %1735 = vst [vmem:[%s2996_s13 + $0x60] sm:$0xff] %v2322_v30 }

</bundles_post_ra>
